<compile_context>
chip_gen: v6e
topology: v6e:2x2x1
jax: 0.10.0
libtpu: 0.0.40
codegen_flags: <defaults>
</compile_context>

<pallas_src>
import functools

import jax
import jax.numpy as jnp
from jax.experimental import pallas as pl
from jax.experimental.pallas import tpu as pltpu


# ---------------------------------------------------------------------------
# Kernel body
# ---------------------------------------------------------------------------
def _mlp_fused_kernel(*refs, n_layers):
    """Fused multi-layer MLP: y = W_L(...silu(W_1 x + b_1)...) + b_L.

    refs = (x_ref, w0_ref, b0_ref, w1_ref, b1_ref, ..., o_ref)
    Weights w_l are pre-transposed to (in, out); biases are (1, out) f32.
    The layer loop is unrolled at trace time (n_layers is static).
    """
    x_ref, *wb_refs, o_ref = refs

    h = x_ref[...]                                   # (tm, K0), original dtype
    for l in range(n_layers):
        w = wb_refs[2 * l][...]                      # (K_l, N_l), compute dtype
        b = wb_refs[2 * l + 1][...]                  # (1,  N_l), f32
        # Cast activation to the MXU operand dtype in-kernel (no wrapper pass),
        # single-shot matmul with f32 accumulation.
        y = jnp.dot(h.astype(w.dtype), w, preferred_element_type=jnp.float32)
        y = y + b.astype(jnp.float32)
        if l < n_layers - 1:
            y = y * jax.nn.sigmoid(y)                # SiLU in f32 (VPU + EUP)
        h = y
    o_ref[...] = h.astype(o_ref.dtype)


# ---------------------------------------------------------------------------
# Parameter prep (one-time, outside the per-forward path)
# ---------------------------------------------------------------------------
def prepare_mlp_params(params, compute_dtype=jnp.float32):
    """Transpose (out,in)->(in,out) and optionally cast weights (e.g. bf16 for the
    MXU + halved weight DMA). Biases stay f32 (bias/SiLU math stays f32)."""
    prepared = []
    for (w, b) in params:
        n_out = w.shape[0]
        w_t = jnp.transpose(w).astype(compute_dtype)          # (in, out)
        b_arr = b if b is not None else jnp.zeros((n_out,), jnp.float32)
        b2 = b_arr.astype(jnp.float32).reshape(1, n_out)
        prepared.append((w_t, b2))
    return prepared


# ---------------------------------------------------------------------------
# Tiling / budgeting helpers
# ---------------------------------------------------------------------------
def _sublane_quantum(dtype):
    """Rows per sublane tile for a dtype (f32->8, bf16->16, int8/fp8->32)."""
    bits = jnp.dtype(dtype).itemsize * 8
    return max(8, 256 // bits)


def _pick_tm(M, row_quant, cap=512):
    """Prefer a tm that divides M (no pad/slice); cap at 512 rows."""
    cap = max(row_quant, cap - cap % row_quant)
    if M <= cap:
        return -(-M // row_quant) * row_quant
    for cand in range(cap, row_quant - 1, -row_quant):
        if M % cand == 0:
            return cand
    return cap


def _vmem_limit_bytes(prepared, tm, K0, n_out, x_dtype, out_dtype):
    """Explicit scoped-VMEM budget: weights (conservatively 2 buffers, covers the
    double-buffered fallback), double-buffered x/out tiles, f32 intermediates."""
    weights_bytes = sum(w.size * w.dtype.itemsize + b.size * b.dtype.itemsize
                        for (w, b) in prepared)
    x_tile = tm * K0 * jnp.dtype(x_dtype).itemsize
    o_tile = tm * n_out * jnp.dtype(out_dtype).itemsize
    max_n = max(max(w.shape[1] for (w, _) in prepared), K0)
    interm = 4 * tm * max_n * 4                       # a few live f32 intermediates
    needed = 2 * weights_bytes + 2 * (x_tile + o_tile) + interm
    limit = needed + needed // 4 + (4 << 20)          # 25% + 4 MiB margin
    try:
        phys = int(pltpu.get_tpu_info().vmem_capacity_bytes)
    except Exception:
        phys = 64 << 20                               # v7x per-TC VMEM (worst case)
    return int(min(max(limit, 16 << 20), phys - (8 << 20)))


# ---------------------------------------------------------------------------
# Forward wrapper
# ---------------------------------------------------------------------------
# Lazily-probed: does this Pallas build accept pipeline_mode=pl.Buffered(1) on
# grid-invariant weight blocks?  (Single-buffering halves resident-weight VMEM.)
_SINGLE_BUFFER_WEIGHTS_OK = None


def mlp_forward(x, prepared, *, tm=None):
    """Run the fused MLP kernel. `prepared` comes from prepare_mlp_params."""
    global _SINGLE_BUFFER_WEIGHTS_OK

    n_layers = len(prepared)
    M, K0 = x.shape
    assert prepared[0][0].shape[0] == K0
    out_dtype = x.dtype
    n_out = prepared[-1][0].shape[1]

    # Sublane quantum from the dtypes actually tiled per grid step (x and out),
    # NOT the weight compute dtype (weights are full-extent blocks).
    row_quant = max(_sublane_quantum(x.dtype), _sublane_quantum(out_dtype))
    if tm is None:
        tm = _pick_tm(M, row_quant)
    tm = max(row_quant, -(-tm // row_quant) * row_quant)

    m_pad = pl.cdiv(M, tm) * tm
    x_in = x if m_pad == M else jnp.pad(x, ((0, m_pad - M), (0, 0)))

    flat_inputs = [x_in]
    for (w_t, b2) in prepared:
        flat_inputs += [w_t, b2]

    vmem_limit = _vmem_limit_bytes(prepared, tm, K0, n_out, x.dtype, out_dtype)
    kernel = functools.partial(_mlp_fused_kernel, n_layers=n_layers)

    def run(single_buffer_weights):
        wb_kwargs = {}
        if single_buffer_weights:
            wb_kwargs = {"pipeline_mode": pl.Buffered(1)}
        # Batch tiled along the single grid axis; weights/biases are full-extent
        # blocks with constant index maps -> fetched once, VMEM-resident.
        in_specs = [pl.BlockSpec((tm, K0), lambda i: (i, 0))]
        for (w_t, b2) in prepared:
            k_l, n_l = w_t.shape
            in_specs.append(pl.BlockSpec((k_l, n_l), lambda i: (0, 0), **wb_kwargs))
            in_specs.append(pl.BlockSpec((1, n_l), lambda i: (0, 0), **wb_kwargs))
        return pl.pallas_call(
            kernel,
            out_shape=jax.ShapeDtypeStruct((m_pad, n_out), out_dtype),
            grid_spec=pltpu.PrefetchScalarGridSpec(
                num_scalar_prefetch=0,
                grid=(m_pad // tm,),
                in_specs=in_specs,
                out_specs=pl.BlockSpec((tm, n_out), lambda i: (i, 0)),
            ),
            compiler_params=pltpu.CompilerParams(
                # Batch axis is embarrassingly parallel (megacore sharding on
                # v7x once m_pad // tm >= 2; pass tm=M//2 there when compute-bound).
                dimension_semantics=("parallel",),
                vmem_limit_bytes=vmem_limit,
            ),
        )(*flat_inputs)

    if _SINGLE_BUFFER_WEIGHTS_OK is None:
        if not hasattr(pl, "Buffered"):
            _SINGLE_BUFFER_WEIGHTS_OK = False
            out = run(False)
        else:
            try:
                out = jax.block_until_ready(run(True))
                _SINGLE_BUFFER_WEIGHTS_OK = True
            except Exception:
                # This Pallas build does not support single-buffered grid-invariant
                # blocks via pipeline_mode; fall back to the proven default specs.
                _SINGLE_BUFFER_WEIGHTS_OK = False
                out = run(False)
    else:
        out = run(_SINGLE_BUFFER_WEIGHTS_OK)

    return out if m_pad == M else out[:M]


# ---------------------------------------------------------------------------
# Reference + synthetic init (mirrors the module's layer shapes / init scales)
# ---------------------------------------------------------------------------
def init_mlp_params(key, in_hiddens, med_hiddens, out_hiddens, layers, bias=True):
    """Hidden layers: kaiming-style sqrt(2/fan_in) (init_relu analog).
    Last layer: xavier-style sqrt(1/fan_in) (init_xavier analog).
    PyTorch Linear weight shape is (out, in); bias shape is (out,)."""
    params = []
    hiddens = in_hiddens
    _out = med_hiddens
    for l in range(layers):
        last = l == layers - 1
        if last:
            _out = out_hiddens
        key, wk = jax.random.split(key)
        scale = (1.0 / hiddens) ** 0.5 if last else (2.0 / hiddens) ** 0.5
        w = jax.random.normal(wk, (_out, hiddens), dtype=jnp.float32) * scale
        b = jnp.zeros((_out,), dtype=jnp.float32) if bias else None
        params.append((w, b))
        hiddens = med_hiddens
    return params


def mlp_reference(x, params):
    """Pure-JAX f32 reference for correctness checking."""
    n_layers = len(params)
    for l, (w, b) in enumerate(params):
        last = l == n_layers - 1
        y = x @ w.T + (b if b is not None else 0.0)
        x = y if last else y * jax.nn.sigmoid(y)
    return x


if __name__ == "__main__":
    # Small shapes consistent with the module (batch x features MLP).
    batch = 16
    in_hiddens, med_hiddens, out_hiddens = 256, 256, 128
    layers = 2   # Linear+SiLU, Linear+Identity

    key = jax.random.PRNGKey(0)
    key, xk = jax.random.split(key)
    x = jax.random.normal(xk, (batch, in_hiddens), dtype=jnp.float32)

    params = init_mlp_params(key, in_hiddens, med_hiddens, out_hiddens, layers)
    ref = mlp_reference(x, params)

    # f32 path — numerically matches the reference tightly. batch=16 divides the
    # row tile exactly -> no pad / slice wrapper ops.
    prepared_f32 = prepare_mlp_params(params, compute_dtype=jnp.float32)
    out = jax.block_until_ready(mlp_forward(x, prepared_f32))
    assert out.shape == (batch, out_hiddens)
    assert jnp.allclose(out, ref, atol=1e-4, rtol=1e-4)

    # bf16-weight MXU path (v6e/v7x fast path; activation math stays f32).
    prepared_bf16 = prepare_mlp_params(params, compute_dtype=jnp.bfloat16)
    out_bf16 = jax.block_until_ready(mlp_forward(x, prepared_bf16))
    assert out_bf16.shape == (batch, out_hiddens)
    assert jnp.allclose(out_bf16, ref, atol=1e-1, rtol=5e-2)

    # Ragged batch exercises the pad/slice fallback path (only used when needed).
    out_r = jax.block_until_ready(mlp_forward(x[:10], prepared_f32))
    assert out_r.shape == (10, out_hiddens)
    assert jnp.allclose(out_r, ref[:10], atol=1e-4, rtol=1e-4)

    # Deeper MLP (3 layers: SiLU, SiLU, Identity) in f32.
    params3 = init_mlp_params(jax.random.PRNGKey(1), in_hiddens, med_hiddens,
                              out_hiddens, 3)
    ref3 = mlp_reference(x, params3)
    out3 = jax.block_until_ready(mlp_forward(x, prepare_mlp_params(params3)))
    assert out3.shape == (batch, out_hiddens)
    assert jnp.allclose(out3, ref3, atol=1e-4, rtol=1e-4)

    print("KERNEL_OK")
</pallas_src>

<mosaic_0001>
module attributes {stable_mosaic.version = 11 : i64} {
  func.func @_mlp_fused_kernel(%arg0: i32, %arg1: memref<16x256xf32, #tpu.memory_space<vmem>>, %arg2: memref<256x256xf32, #tpu.memory_space<vmem>>, %arg3: memref<1x256xf32, #tpu.memory_space<vmem>>, %arg4: memref<256x128xf32, #tpu.memory_space<vmem>>, %arg5: memref<1x128xf32, #tpu.memory_space<vmem>>, %arg6: memref<16x128xf32, #tpu.memory_space<vmem>>) attributes {dimension_semantics = [#tpu.dimension_semantics<parallel>], iteration_bounds = array<i64: 1>, scalar_prefetch = 0 : i64, scratch_operands = 0 : i64, tpu.core_type = #tpu.core_type<tc>, window_params = [{transform_indices = @transform_0, window_bounds = array<i64: 16, 256>}, {pipeline_mode = #tpu.pipeline_mode<synchronous>, transform_indices = @transform_1, window_bounds = array<i64: 256, 256>}, {pipeline_mode = #tpu.pipeline_mode<synchronous>, transform_indices = @transform_2, window_bounds = array<i64: 1, 256>}, {pipeline_mode = #tpu.pipeline_mode<synchronous>, transform_indices = @transform_3, window_bounds = array<i64: 256, 128>}, {pipeline_mode = #tpu.pipeline_mode<synchronous>, transform_indices = @transform_4, window_bounds = array<i64: 1, 128>}, {transform_indices = @transform_5, window_bounds = array<i64: 16, 128>}]} {
    %c0 = arith.constant 0 : index
    %c0_0 = arith.constant 0 : index
    %0 = vector.load %arg1[%c0, %c0_0] : memref<16x256xf32, #tpu.memory_space<vmem>>, vector<16x256xf32>
    %c0_1 = arith.constant 0 : index
    %c0_2 = arith.constant 0 : index
    %1 = vector.load %arg2[%c0_1, %c0_2] : memref<256x256xf32, #tpu.memory_space<vmem>>, vector<256x256xf32>
    %c0_3 = arith.constant 0 : index
    %c0_4 = arith.constant 0 : index
    %2 = vector.load %arg3[%c0_3, %c0_4] : memref<1x256xf32, #tpu.memory_space<vmem>>, vector<1x256xf32>
    %cst = arith.constant dense<0.000000e+00> : vector<16x256xf32>
    %3 = tpu.matmul %0, %1, %cst {dimension_numbers = #tpu.dot_dimension_numbers<[1], [0], [0], [1], [0, 0, 1, 1], [], []>} : vector<16x256xf32>, vector<256x256xf32>, vector<16x256xf32> -> vector<16x256xf32>
    %4 = vector.broadcast %2 : vector<1x256xf32> to vector<16x256xf32>
    %5 = arith.addf %3, %4 : vector<16x256xf32>
    %6 = arith.negf %5 : vector<16x256xf32>
    %7 = math.exp %6 : vector<16x256xf32>
    %cst_5 = arith.constant 1.000000e+00 : f32
    %8 = vector.broadcast %cst_5 : f32 to vector<16x256xf32>
    %9 = arith.addf %8, %7 : vector<16x256xf32>
    %10 = arith.divf %8, %9 : vector<16x256xf32>
    %11 = arith.mulf %5, %10 : vector<16x256xf32>
    %c0_6 = arith.constant 0 : index
    %c0_7 = arith.constant 0 : index
    %12 = vector.load %arg4[%c0_6, %c0_7] : memref<256x128xf32, #tpu.memory_space<vmem>>, vector<256x128xf32>
    %c0_8 = arith.constant 0 : index
    %c0_9 = arith.constant 0 : index
    %13 = vector.load %arg5[%c0_8, %c0_9] : memref<1x128xf32, #tpu.memory_space<vmem>>, vector<1x128xf32>
    %cst_10 = arith.constant dense<0.000000e+00> : vector<16x128xf32>
    %14 = tpu.matmul %11, %12, %cst_10 {dimension_numbers = #tpu.dot_dimension_numbers<[1], [0], [0], [1], [0, 0, 1, 1], [], []>} : vector<16x256xf32>, vector<256x128xf32>, vector<16x128xf32> -> vector<16x128xf32>
    %15 = vector.broadcast %13 : vector<1x128xf32> to vector<16x128xf32>
    %16 = arith.addf %14, %15 : vector<16x128xf32>
    %c0_11 = arith.constant 0 : index
    %c0_12 = arith.constant 0 : index
    %17 = vector.load %arg6[%c0_11, %c0_12] : memref<16x128xf32, #tpu.memory_space<vmem>>, vector<16x128xf32>
    tpu.vector_store %arg6[%c0_11, %c0_12], %16 {strides = array<i32>} : memref<16x128xf32, #tpu.memory_space<vmem>>, vector<16x128xf32>,
    return
  }
  func.func @transform_0(%arg0: i32) -> (i32, i32) {
    %c0_i32 = arith.constant 0 : i32
    %c0_i32_0 = arith.constant 0 : i32
    return %arg0, %c0_i32 : i32, i32
  }
  func.func @transform_1(%arg0: i32) -> (i32, i32) {
    %c0_i32 = arith.constant 0 : i32
    %c0_i32_0 = arith.constant 0 : i32
    %c0_i32_1 = arith.constant 0 : i32
    return %c0_i32, %c0_i32_0 : i32, i32
  }
  func.func @transform_2(%arg0: i32) -> (i32, i32) {
    %c0_i32 = arith.constant 0 : i32
    %c0_i32_0 = arith.constant 0 : i32
    %c0_i32_1 = arith.constant 0 : i32
    return %c0_i32, %c0_i32_0 : i32, i32
  }
  func.func @transform_3(%arg0: i32) -> (i32, i32) {
    %c0_i32 = arith.constant 0 : i32
    %c0_i32_0 = arith.constant 0 : i32
    %c0_i32_1 = arith.constant 0 : i32
    return %c0_i32, %c0_i32_0 : i32, i32
  }
  func.func @transform_4(%arg0: i32) -> (i32, i32) {
    %c0_i32 = arith.constant 0 : i32
    %c0_i32_0 = arith.constant 0 : i32
    %c0_i32_1 = arith.constant 0 : i32
    return %c0_i32, %c0_i32_0 : i32, i32
  }
  func.func @transform_5(%arg0: i32) -> (i32, i32) {
    %c0_i32 = arith.constant 0 : i32
    %c0_i32_0 = arith.constant 0 : i32
    return %arg0, %c0_i32 : i32, i32
  }
}

module attributes {stable_mosaic.version = 11 : i64} {
  func.func @_mlp_fused_kernel(%arg0: i32, %arg1: memref<16x256xf32, #tpu.memory_space<vmem>>, %arg2: memref<256x256xf32, #tpu.memory_space<vmem>>, %arg3: memref<1x256xf32, #tpu.memory_space<vmem>>, %arg4: memref<256x128xf32, #tpu.memory_space<vmem>>, %arg5: memref<1x128xf32, #tpu.memory_space<vmem>>, %arg6: memref<16x128xf32, #tpu.memory_space<vmem>>) attributes {dimension_semantics = [#tpu.dimension_semantics<parallel>], iteration_bounds = array<i64: 1>, scalar_prefetch = 0 : i64, scratch_operands = 0 : i64, tpu.core_type = #tpu.core_type<tc>, window_params = [{transform_indices = @transform_0, window_bounds = array<i64: 16, 256>}, {pipeline_mode = #tpu.pipeline_mode<synchronous>, transform_indices = @transform_1, window_bounds = array<i64: 256, 256>}, {pipeline_mode = #tpu.pipeline_mode<synchronous>, transform_indices = @transform_2, window_bounds = array<i64: 1, 256>}, {pipeline_mode = #tpu.pipeline_mode<synchronous>, transform_indices = @transform_3, window_bounds = array<i64: 256, 128>}, {pipeline_mode = #tpu.pipeline_mode<synchronous>, transform_indices = @transform_4, window_bounds = array<i64: 1, 128>}, {transform_indices = @transform_5, window_bounds = array<i64: 16, 128>}]} {
    %c0 = arith.constant 0 : index
    %c0_0 = arith.constant 0 : index
    %0 = vector.load %arg1[%c0, %c0_0] : memref<16x256xf32, #tpu.memory_space<vmem>>, vector<16x256xf32>
    %c0_1 = arith.constant 0 : index
    %c0_2 = arith.constant 0 : index
    %1 = vector.load %arg2[%c0_1, %c0_2] : memref<256x256xf32, #tpu.memory_space<vmem>>, vector<256x256xf32>
    %c0_3 = arith.constant 0 : index
    %c0_4 = arith.constant 0 : index
    %2 = vector.load %arg3[%c0_3, %c0_4] : memref<1x256xf32, #tpu.memory_space<vmem>>, vector<1x256xf32>
    %cst = arith.constant dense<0.000000e+00> : vector<16x256xf32>
    %3 = tpu.matmul %0, %1, %cst {dimension_numbers = #tpu.dot_dimension_numbers<[1], [0], [0], [1], [0, 0, 1, 1], [], []>} : vector<16x256xf32>, vector<256x256xf32>, vector<16x256xf32> -> vector<16x256xf32>
    %4 = vector.broadcast %2 : vector<1x256xf32> to vector<16x256xf32>
    %5 = arith.addf %3, %4 : vector<16x256xf32>
    %6 = arith.negf %5 : vector<16x256xf32>
    %7 = math.exp %6 : vector<16x256xf32>
    %cst_5 = arith.constant 1.000000e+00 : f32
    %8 = vector.broadcast %cst_5 : f32 to vector<16x256xf32>
    %9 = arith.addf %8, %7 : vector<16x256xf32>
    %10 = arith.divf %8, %9 : vector<16x256xf32>
    %11 = arith.mulf %5, %10 : vector<16x256xf32>
    %c0_6 = arith.constant 0 : index
    %c0_7 = arith.constant 0 : index
    %12 = vector.load %arg4[%c0_6, %c0_7] : memref<256x128xf32, #tpu.memory_space<vmem>>, vector<256x128xf32>
    %c0_8 = arith.constant 0 : index
    %c0_9 = arith.constant 0 : index
    %13 = vector.load %arg5[%c0_8, %c0_9] : memref<1x128xf32, #tpu.memory_space<vmem>>, vector<1x128xf32>
    %cst_10 = arith.constant dense<0.000000e+00> : vector<16x128xf32>
    %14 = tpu.matmul %11, %12, %cst_10 {dimension_numbers = #tpu.dot_dimension_numbers<[1], [0], [0], [1], [0, 0, 1, 1], [], []>} : vector<16x256xf32>, vector<256x128xf32>, vector<16x128xf32> -> vector<16x128xf32>
    %15 = vector.broadcast %13 : vector<1x128xf32> to vector<16x128xf32>
    %16 = arith.addf %14, %15 : vector<16x128xf32>
    %c0_11 = arith.constant 0 : index
    %c0_12 = arith.constant 0 : index
    %17 = vector.load %arg6[%c0_11, %c0_12] : memref<16x128xf32, #tpu.memory_space<vmem>>, vector<16x128xf32>
    tpu.vector_store %arg6[%c0_11, %c0_12], %16 {strides = array<i32>} : memref<16x128xf32, #tpu.memory_space<vmem>>, vector<16x128xf32>,
    return
  }
  func.func @transform_0(%arg0: i32) -> (i32, i32) {
    %c0_i32 = arith.constant 0 : i32
    %c0_i32_0 = arith.constant 0 : i32
    return %arg0, %c0_i32 : i32, i32
  }
  func.func @transform_1(%arg0: i32) -> (i32, i32) {
    %c0_i32 = arith.constant 0 : i32
    %c0_i32_0 = arith.constant 0 : i32
    %c0_i32_1 = arith.constant 0 : i32
    return %c0_i32, %c0_i32_0 : i32, i32
  }
  func.func @transform_2(%arg0: i32) -> (i32, i32) {
    %c0_i32 = arith.constant 0 : i32
    %c0_i32_0 = arith.constant 0 : i32
    %c0_i32_1 = arith.constant 0 : i32
    return %c0_i32, %c0_i32_0 : i32, i32
  }
  func.func @transform_3(%arg0: i32) -> (i32, i32) {
    %c0_i32 = arith.constant 0 : i32
    %c0_i32_0 = arith.constant 0 : i32
    %c0_i32_1 = arith.constant 0 : i32
    return %c0_i32, %c0_i32_0 : i32, i32
  }
  func.func @transform_4(%arg0: i32) -> (i32, i32) {
    %c0_i32 = arith.constant 0 : i32
    %c0_i32_0 = arith.constant 0 : i32
    %c0_i32_1 = arith.constant 0 : i32
    return %c0_i32, %c0_i32_0 : i32, i32
  }
  func.func @transform_5(%arg0: i32) -> (i32, i32) {
    %c0_i32 = arith.constant 0 : i32
    %c0_i32_0 = arith.constant 0 : i32
    return %arg0, %c0_i32 : i32, i32
  }
}

</mosaic_0001>

<bundles_post_ra>
// kernel: tpu_custom_call.1
= control target key start
LH: loop header
LB: loop body
LE: loop exit
PB: predicated region body
PF: predicated region fallthrough
CT: control target
= control target key end

     0   :  { %10 = vsyncpa [#allocation3], 0  ;;  %s596_s0 = inlined_call_operand.hbm [shape: f32[16,256], index: 0, kind: input, shape index: {}]   ;;  %s597_s1 = inlined_call_operand.hbm [shape: f32[256,256], index: 1, kind: input, shape index: {}]   ;;  %s598_s2 = inlined_call_operand.vmem [shape: f32[1,256], index: 2, kind: input, shape index: {}]   ;;  %s599_s3 = inlined_call_operand.hbm [shape: f32[256,128], index: 3, kind: input, shape index: {}]   ;;  %s600_s4 = inlined_call_operand.vmem [shape: f32[1,128], index: 4, kind: input, shape index: {}]   ;;  %s601_s5 = inlined_call_operand.hbm [shape: f32[16,128], index: 5, kind: output, shape index: {}]  }
   0x1   :  { %11 = vsyncpa [#allocation6], 0 }
   0x2   :  { %12 = vsyncpa [#allocation4], 0  ;;  %s534_s18 = smov [#allocation5]   ;;  %s535_s20 = smov [#allocation2]  }
   0x3   :  { %s30_s19 = sshll.u32 %s534_s18, 4  ;;  %s18_s21 = sshll.u32 %s535_s20, 4  ;;  %s31_s19 = int_to_ptr.vmem [resolvable:$true] %s30_s19  ;;  %s19_s21 = int_to_ptr.vmem [resolvable:$true] %s18_s21 }
   0x4   :  { %s456_s22 = scalar_lea.vmem %s31_s19, 8192  ;;  %p461_p1 = scmp.lt.s32.totalorder %s31_s19, %s31_s19 }
   0x5   :  { %p457_p0 = scmp.ne.s32.totalorder %s31_s19, %s456_s22  ;;  %p462_p2 = scmp.lt.s32.totalorder %s456_s22, %s456_s22 }
   0x7   :  { %p463_p3 = por %p462_p2, %p461_p1 }
   0x9   :  { %p464_p4 = pnand %p463_p3, %p457_p0 }
   0xb   :  { %467 = shalt.err (!%p464_p4)
}
   0xc   :  { %s536_s23 = smov 256   ;;  %s537_s24 = smov 16  }
   0xd   :  { %36 = dma.hbm_to_vmem [thread:$0]  %s597_s1, 8192, %s31_s19, [#allocation6], %s536_s23, %s536_s23, %s537_s24  }
   0xe   :  { %s476_s27 = scalar_lea.vmem %s19_s21, 512  ;;  %p481_p6 = scmp.lt.s32.totalorder %s19_s21, %s19_s21 }
   0xf   :  { %p477_p5 = scmp.ne.s32.totalorder %s19_s21, %s476_s27  ;;  %p482_p7 = scmp.lt.s32.totalorder %s476_s27, %s476_s27 }
  0x11   :  { %p483_p8 = por %p482_p7, %p481_p6 }
  0x13   :  { %p484_p9 = pnand %p483_p8, %p477_p5 }
  0x15   :  { %487 = shalt.err (!%p484_p9)
}
  0x16   :  { %24 = dma.hbm_to_vmem [thread:$0]  %s596_s0, 512, %s19_s21, [#allocation3], %s536_s23, %s536_s23, %s537_s24  }
  0x17   :  { %s538_s30 = smov [#allocation7]  }
  0x18   :  { %s44_s6 = sshll.u32 %s538_s30, 4  ;;  %s45_s6 = int_to_ptr.vmem [resolvable:$true] %s44_s6 }
  0x19   :  { %s496_s7 = scalar_lea.vmem %s45_s6, 4096  ;;  %p501_p11 = scmp.lt.s32.totalorder %s45_s6, %s45_s6 }
  0x1a   :  { %p497_p10 = scmp.ne.s32.totalorder %s45_s6, %s496_s7  ;;  %p502_p12 = scmp.lt.s32.totalorder %s496_s7, %s496_s7 }
  0x1c   :  { %p503_p13 = por %p502_p12, %p501_p11 }
  0x1e   :  { %p504_p0 = pnand %p503_p13, %p497_p10 }
  0x20   :  { %507 = shalt.err (!%p504_p0)
}
  0x21   :  { %s539_s1 = smov 128   ;;  %s540_s8 = smov 8  }
  0x22   :  { %50 = dma.hbm_to_vmem [thread:$0]  %s599_s3, 4096, %s45_s6, [#allocation6], %s539_s1, %s539_s1, %s540_s8  }
  0x23   :  { %528 = dma.done.wait [#allocation3], 512  }
  0x24   :  { %529 = vsyncadd [#allocation3], 4294966784 }
  0x25   :  { %530 = dma.done.wait [#allocation6], 12288  }
  0x26   :  { %531 = vsyncadd [#allocation6], 4294955008  ;;  %v97_v0 = vld [vmem:[#allocation5 + $0xf8] sm:$0xff]  ;;  %v96_v1 = vld [vmem:[#allocation5 + $0xf0] sm:$0xff]  ;;  %s541_s12 = smov [#allocation8]  }
  0x27   :  { %v95_v2 = vld [vmem:[#allocation5 + $0xe8] sm:$0xff]  ;;  %142 = vmatprep.subr.mxu0 %v97_v0  ;;  %v94_v3 = vld [vmem:[#allocation5 + $0xe0] sm:$0xff]  ;;  %v93_v4 = vld [vmem:[#allocation5 + $0xd8] sm:$0xff]  ;;  %s368_s13 = sshll.u32 %s541_s12, 4  ;;  %s369_s13 = int_to_ptr.vmem [resolvable:$true] %s368_s13 }
  0x28   :  { %143 = vmatpush1.msra.mxu0 %v96_v1  ;;  %v92_v5 = vld [vmem:[#allocation5 + $0xd0] sm:$0xff]  ;;  %v91_v6 = vld [vmem:[#allocation5 + $0xc8] sm:$0xff]  ;;  %v90_v7 = vld [vmem:[#allocation5 + $0xc0] sm:$0xff]  ;;  %s508_s14 = scalar_lea.vmem %s369_s13, 256  ;;  %p513_p2 = scmp.lt.s32.totalorder %s369_s13, %s369_s13 }
  0x29   :  { %144 = vmatprep.subr.mxu0 %v95_v2  ;;  %v89_v8 = vld [vmem:[#allocation5 + $0xb8] sm:$0xff]  ;;  %v88_v9 = vld [vmem:[#allocation5 + $0xb0] sm:$0xff]  ;;  %v87_v10 = vld [vmem:[#allocation5 + $0xa8] sm:$0xff]  ;;  %p509_p1 = scmp.ne.s32.totalorder %s369_s13, %s508_s14  ;;  %p514_p3 = scmp.lt.s32.totalorder %s508_s14, %s508_s14 }
  0x2a   :  { %145 = vmatpush1.msra.mxu0 %v94_v3  ;;  %v86_v11 = vld [vmem:[#allocation5 + $0xa0] sm:$0xff]  ;;  %v85_v12 = vld [vmem:[#allocation5 + $0x98] sm:$0xff]  ;;  %v84_v13 = vld [vmem:[#allocation5 + $0x90] sm:$0xff] }
  0x2b   :  { %146 = vmatprep.subr.mxu0 %v93_v4  ;;  %v83_v14 = vld [vmem:[#allocation5 + $0x88] sm:$0xff]  ;;  %v82_v15 = vld [vmem:[#allocation5 + $0x80] sm:$0xff]  ;;  %v81_v16 = vld [vmem:[#allocation5 + $0x78] sm:$0xff]  ;;  %p515_p4 = por %p514_p3, %p513_p2 }
  0x2c   :  { %147 = vmatpush1.msra.mxu0 %v92_v5  ;;  %v80_v17 = vld [vmem:[#allocation5 + $0x70] sm:$0xff]  ;;  %v79_v18 = vld [vmem:[#allocation5 + $0x68] sm:$0xff]  ;;  %v78_v19 = vld [vmem:[#allocation5 + $0x60] sm:$0xff] }
  0x2d   :  { %148 = vmatprep.subr.mxu0 %v91_v6  ;;  %v77_v20 = vld [vmem:[#allocation5 + $0x58] sm:$0xff]  ;;  %v76_v21 = vld [vmem:[#allocation5 + $0x50] sm:$0xff]  ;;  %v75_v22 = vld [vmem:[#allocation5 + $0x48] sm:$0xff]  ;;  %p516_p5 = pnand %p515_p4, %p509_p1 }
  0x2e   :  { %149 = vmatpush1.msra.mxu0 %v90_v7  ;;  %v74_v23 = vld [vmem:[#allocation5 + $0x40] sm:$0xff]  ;;  %v63_v24 = vld [vmem:[#allocation2 + $0x8] sm:$0xff]  ;;  %v73_v25 = vld [vmem:[#allocation5 + $0x38] sm:$0xff] }
  0x2f   :  { %150 = vmatprep.subr.mxu0 %v89_v8  ;;  %206 = vmatprep.mubr.f32.mxu0 %v63_v24  ;;  %v72_v26 = vld [vmem:[#allocation5 + $0x30] sm:$0xff]  ;;  %v71_v27 = vld [vmem:[#allocation5 + $0x28] sm:$0xff]  ;;  %v70_v28 = vld [vmem:[#allocation5 + $0x20] sm:$0xff] }
  0x30   :  { %151 = vmatpush1.msra.mxu0 %v88_v9  ;;  %v69_v29 = vld [vmem:[#allocation5 + $0x18] sm:$0xff]  ;;  %v68_v30 = vld [vmem:[#allocation5 + $0x10] sm:$0xff]  ;;  %v67_v31 = vld [vmem:[#allocation5 + $0x8] sm:$0xff] }
  0x31   :  { %152 = vmatprep.subr.mxu0 %v87_v10  ;;  %v66_v32 = vld [vmem:[#allocation5] sm:$0xff]  ;;  %v129_v33 = vld [vmem:[#allocation5 + $0x1f8] sm:$0xff]  ;;  %v128_v34 = vld [vmem:[#allocation5 + $0x1f0] sm:$0xff] }
  0x32   :  { %153 = vmatpush1.msra.mxu0 %v86_v11  ;;  %v127_v35 = vld [vmem:[#allocation5 + $0x1e8] sm:$0xff]  ;;  %v126_v36 = vld [vmem:[#allocation5 + $0x1e0] sm:$0xff]  ;;  %v125_v37 = vld [vmem:[#allocation5 + $0x1d8] sm:$0xff] }
  0x33   :  { %154 = vmatprep.subr.mxu0 %v85_v12  ;;  %v124_v38 = vld [vmem:[#allocation5 + $0x1d0] sm:$0xff]  ;;  %v123_v39 = vld [vmem:[#allocation5 + $0x1c8] sm:$0xff]  ;;  %v122_v40 = vld [vmem:[#allocation5 + $0x1c0] sm:$0xff] }
  0x34   :  { %155 = vmatpush1.msra.mxu0 %v84_v13  ;;  %v121_v41 = vld [vmem:[#allocation5 + $0x1b8] sm:$0xff]  ;;  %v120_v42 = vld [vmem:[#allocation5 + $0x1b0] sm:$0xff]  ;;  %v119_v43 = vld [vmem:[#allocation5 + $0x1a8] sm:$0xff] }
  0x35   :  { %156 = vmatprep.subr.mxu0 %v83_v14  ;;  %v118_v44 = vld [vmem:[#allocation5 + $0x1a0] sm:$0xff]  ;;  %v117_v45 = vld [vmem:[#allocation5 + $0x198] sm:$0xff]  ;;  %v116_v46 = vld [vmem:[#allocation5 + $0x190] sm:$0xff] }
  0x36   :  { %157 = vmatpush1.msra.mxu0 %v82_v15  ;;  %v115_v47 = vld [vmem:[#allocation5 + $0x188] sm:$0xff]  ;;  %v114_v48 = vld [vmem:[#allocation5 + $0x180] sm:$0xff]  ;;  %v113_v49 = vld [vmem:[#allocation5 + $0x178] sm:$0xff] }
  0x37   :  { %158 = vmatprep.subr.mxu0 %v81_v16  ;;  %v112_v50 = vld [vmem:[#allocation5 + $0x170] sm:$0xff]  ;;  %v111_v51 = vld [vmem:[#allocation5 + $0x168] sm:$0xff]  ;;  %v110_v52 = vld [vmem:[#allocation5 + $0x160] sm:$0xff] }
  0x38   :  { %159 = vmatpush1.msra.mxu0 %v80_v17  ;;  %v109_v53 = vld [vmem:[#allocation5 + $0x158] sm:$0xff]  ;;  %v108_v54 = vld [vmem:[#allocation5 + $0x150] sm:$0xff]  ;;  %v107_v55 = vld [vmem:[#allocation5 + $0x148] sm:$0xff] }
  0x39   :  { %160 = vmatprep.subr.mxu0 %v79_v18  ;;  %v106_v56 = vld [vmem:[#allocation5 + $0x140] sm:$0xff]  ;;  %v105_v57 = vld [vmem:[#allocation5 + $0x138] sm:$0xff]  ;;  %v104_v58 = vld [vmem:[#allocation5 + $0x130] sm:$0xff] }
  0x3a   :  { %161 = vmatpush1.msra.mxu0 %v78_v19  ;;  %v103_v59 = vld [vmem:[#allocation5 + $0x128] sm:$0xff]  ;;  %v102_v60 = vld [vmem:[#allocation5 + $0x120] sm:$0xff]  ;;  %v101_v61 = vld [vmem:[#allocation5 + $0x118] sm:$0xff] }
  0x3b   :  { %162 = vmatprep.subr.mxu0 %v77_v20  ;;  %v100_v62 = vld [vmem:[#allocation5 + $0x110] sm:$0xff]  ;;  %v99_v63 = vld [vmem:[#allocation5 + $0x108] sm:$0xff]  ;;  %v98_v0 = vld [vmem:[#allocation5 + $0x100] sm:$0xff] }
  0x3c   :  { %163 = vmatpush1.msra.mxu0 %v76_v21  ;;  %v62_v1 = vld [vmem:[#allocation2] sm:$0xff]  ;;  %v65_v2 = vld [vmem:[#allocation2 + $0x18] sm:$0xff]  ;;  %v64_v3 = vld [vmem:[#allocation2 + $0x10] sm:$0xff] }
  0x3d   :  { %164 = vmatprep.subr.mxu0 %v75_v22  ;;  %v278_v4 = vld [vmem:[#allocation7 + $0xf8] sm:$0xff]  ;;  %v277_v6 = vld [vmem:[#allocation7 + $0xf0] sm:$0xff]  ;;  %v276_v8 = vld [vmem:[#allocation7 + $0xe8] sm:$0xff] }
  0x3e   :  { %165 = vmatpush1.msra.mxu0 %v74_v23  ;;  %386 = vmatprep.subr.mxu1 %v278_v4  ;;  %v262_v5 = vld [vmem:[#allocation7 + $0x78] sm:$0xff]  ;;  %v261_v7 = vld [vmem:[#allocation7 + $0x70] sm:$0xff]  ;;  %v260_v9 = vld [vmem:[#allocation7 + $0x68] sm:$0xff] }
  0x3f   :  { %166 = vmatprep.subr.mxu0 %v73_v25  ;;  %387 = vmatpush3.msra.mxu1 %v262_v5  ;;  %v275_v10 = vld [vmem:[#allocation7 + $0xe0] sm:$0xff]  ;;  %v274_v12 = vld [vmem:[#allocation7 + $0xd8] sm:$0xff]  ;;  %v273_v14 = vld [vmem:[#allocation7 + $0xd0] sm:$0xff] }
  0x40   :  { %167 = vmatpush1.msra.mxu0 %v72_v26  ;;  %388 = vmatprep.subr.mxu1 %v277_v6  ;;  %v259_v11 = vld [vmem:[#allocation7 + $0x60] sm:$0xff]  ;;  %v258_v13 = vld [vmem:[#allocation7 + $0x58] sm:$0xff]  ;;  %v257_v15 = vld [vmem:[#allocation7 + $0x50] sm:$0xff] }
  0x41   :  { %168 = vmatprep.subr.mxu0 %v71_v27  ;;  %389 = vmatpush3.msra.mxu1 %v261_v7  ;;  %v272_v16 = vld [vmem:[#allocation7 + $0xc8] sm:$0xff]  ;;  %v271_v18 = vld [vmem:[#allocation7 + $0xc0] sm:$0xff]  ;;  %v270_v20 = vld [vmem:[#allocation7 + $0xb8] sm:$0xff] }
  0x42   :  { %169 = vmatpush1.msra.mxu0 %v70_v28  ;;  %390 = vmatprep.subr.mxu1 %v276_v8  ;;  %v256_v17 = vld [vmem:[#allocation7 + $0x48] sm:$0xff]  ;;  %v255_v19 = vld [vmem:[#allocation7 + $0x40] sm:$0xff]  ;;  %v254_v21 = vld [vmem:[#allocation7 + $0x38] sm:$0xff] }
  0x43   :  { %170 = vmatprep.subr.mxu0 %v69_v29  ;;  %391 = vmatpush3.msra.mxu1 %v260_v9  ;;  %v269_v22 = vld [vmem:[#allocation7 + $0xb0] sm:$0xff]  ;;  %v268_v24 = vld [vmem:[#allocation7 + $0xa8] sm:$0xff]  ;;  %v267_v26 = vld [vmem:[#allocation7 + $0xa0] sm:$0xff] }
  0x44   :  { %171 = vmatpush1.msra.mxu0 %v68_v30  ;;  %392 = vmatprep.subr.mxu1 %v275_v10  ;;  %v253_v23 = vld [vmem:[#allocation7 + $0x30] sm:$0xff]  ;;  %v252_v25 = vld [vmem:[#allocation7 + $0x28] sm:$0xff]  ;;  %v251_v27 = vld [vmem:[#allocation7 + $0x20] sm:$0xff] }
  0x45   :  { %172 = vmatprep.subr.mxu0 %v67_v31  ;;  %393 = vmatpush3.msra.mxu1 %v259_v11  ;;  %v266_v28 = vld [vmem:[#allocation7 + $0x98] sm:$0xff]  ;;  %v265_v30 = vld [vmem:[#allocation7 + $0x90] sm:$0xff]  ;;  %v385_v8 = vld [vmem:[%s600_s4] ss:$0 sm:$0xff] }
  0x46   :  { %173 = vmatpush1.msra.mxu0 %v66_v32  ;;  %394 = vmatprep.subr.mxu1 %v274_v12  ;;  %v250_v29 = vld [vmem:[#allocation7 + $0x18] sm:$0xff]  ;;  %v249_v31 = vld [vmem:[#allocation7 + $0x10] sm:$0xff]  ;;  %v264_v32 = vld [vmem:[#allocation7 + $0x88] sm:$0xff] }
  0x47   :  { %174 = vmatprep.subr.mxu0 %v129_v33  ;;  %395 = vmatpush3.msra.mxu1 %v258_v13  ;;  %v248_v33 = vld [vmem:[#allocation7 + $0x8] sm:$0xff] }
  0x48   :  { %175 = vmatpush2.msra.mxu0 %v128_v34  ;;  %396 = vmatprep.subr.mxu1 %v273_v14  ;;  %v263_v34 = vld [vmem:[#allocation7 + $0x80] sm:$0xff] }
  0x49   :  { %176 = vmatprep.subr.mxu0 %v127_v35  ;;  %397 = vmatpush3.msra.mxu1 %v257_v15  ;;  %v247_v35 = vld [vmem:[#allocation7] sm:$0xff] }
  0x4a   :  { %177 = vmatpush2.msra.mxu0 %v126_v36  ;;  %398 = vmatprep.subr.mxu1 %v272_v16  ;;  %v132_v36 = vlaneseq }
  0x4b   :  { %178 = vmatprep.subr.mxu0 %v125_v37  ;;  %399 = vmatpush3.msra.mxu1 %v256_v17 }
  0x4c   :  { %179 = vmatpush2.msra.mxu0 %v124_v38  ;;  %400 = vmatprep.subr.mxu1 %v271_v18  ;;  %v133_v37 = vshrl.u32 %v132_v36, 7 }
  0x4d   :  { %180 = vmatprep.subr.mxu0 %v123_v39  ;;  %401 = vmatpush3.msra.mxu1 %v255_v19  ;;  %v130_v39 = vld [vmem:[%s598_s2] sm:$0x3] }
  0x4e   :  { %181 = vmatpush2.msra.mxu0 %v122_v40  ;;  %402 = vmatprep.subr.mxu1 %v270_v20  ;;  %v134_v38 = vsub.s32 0, %v133_v37  ;;  %v138_v40 = vsub.s32 1, %v133_v37 }
  0x4f   :  { %182 = vmatprep.subr.mxu0 %v121_v41  ;;  %403 = vmatpush3.msra.mxu1 %v254_v21 }
  0x50   :  { %183 = vmatpush2.msra.mxu0 %v120_v42  ;;  %404 = vmatprep.subr.mxu1 %v269_v22  ;;  %v135_v41 = vrot.slane %v130_v39, %v134_v38  ;;  %v139_v42 = vrot.slane %v130_v39, %v138_v40 }
  0x51   :  { %184 = vmatprep.subr.mxu0 %v119_v43  ;;  %405 = vmatpush3.msra.mxu1 %v253_v23 }
  0x52   :  { %185 = vmatpush2.msra.mxu0 %v118_v44  ;;  %406 = vmatprep.subr.mxu1 %v268_v24 }
  0x53   :  { %186 = vmatprep.subr.mxu0 %v117_v45  ;;  %407 = vmatpush3.msra.mxu1 %v252_v25 }
  0x54   :  { %187 = vmatpush2.msra.mxu0 %v116_v46  ;;  %408 = vmatprep.subr.mxu1 %v267_v26 }
  0x55   :  { %188 = vmatprep.subr.mxu0 %v115_v47  ;;  %409 = vmatpush3.msra.mxu1 %v251_v27 }
  0x56   :  { %189 = vmatpush2.msra.mxu0 %v114_v48  ;;  %410 = vmatprep.subr.mxu1 %v266_v28 }
  0x57   :  { %190 = vmatprep.subr.mxu0 %v113_v49  ;;  %411 = vmatpush3.msra.mxu1 %v250_v29 }
  0x58   :  { %191 = vmatpush2.msra.mxu0 %v112_v50  ;;  %412 = vmatprep.subr.mxu1 %v265_v30 }
  0x59   :  { %192 = vmatprep.subr.mxu0 %v111_v51  ;;  %413 = vmatpush3.msra.mxu1 %v249_v31 }
  0x5a   :  { %193 = vmatpush2.msra.mxu0 %v110_v52  ;;  %414 = vmatprep.subr.mxu1 %v264_v32 }
  0x5b   :  { %194 = vmatprep.subr.mxu0 %v109_v53  ;;  %415 = vmatpush3.msra.mxu1 %v248_v33 }
  0x5c   :  { %195 = vmatpush2.msra.mxu0 %v108_v54  ;;  %416 = vmatprep.subr.mxu1 %v263_v34 }
  0x5d   :  { %196 = vmatprep.subr.mxu0 %v107_v55  ;;  %417 = vmatpush3.msra.mxu1 %v247_v35 }
  0x5e   :  { %197 = vmatpush2.msra.mxu0 %v106_v56 }
  0x5f   :  { %198 = vmatprep.subr.mxu0 %v105_v57 }
  0x60   :  { %199 = vmatpush2.msra.mxu0 %v104_v58 }
  0x61   :  { %200 = vmatprep.subr.mxu0 %v103_v59 }
  0x62   :  { %201 = vmatpush2.msra.mxu0 %v102_v60 }
  0x63   :  { %202 = vmatprep.subr.mxu0 %v101_v61 }
  0x64   :  { %203 = vmatpush2.msra.mxu0 %v100_v62 }
  0x65   :  { %204 = vmatprep.subr.mxu0 %v99_v63 }
  0x66   :  { %205 = vmatpush2.msra.mxu0 %v98_v0 }
  0x67   :  { %207 = vmatmul.mubr.f32.vlgmr.msra.gmra.mxu0 %v62_v1 }
  0x68   :  { %212 = vmatprep.mubr.f32.mxu0 %v65_v2 }
  0x6b   :  { %213 = vmatmul.mubr.f32.gmra.mxu0 %v64_v3 }
 0x127   :  { %v208_v43 = vpop.f32.mrf.mxu0 }
 0x128   :  { %v209_v44 = vadd.f32 %v208_v43, %v135_v41 }
 0x129   :  { %v210_v45 = vpop.f32.mrf.mxu0 }
 0x12a   :  { %v381_v46 = vmul.f32 -1.442695, %v209_v44  ;;  %v211_v47 = vadd.f32 %v210_v45, %v139_v42 }
 0x12b   :  { %v214_v48 = vpop.f32.mrf.mxu0 }
 0x12c   :  { %432 = vpow2.f32 %v381_v46  ;;  %v382_v49 = vmul.f32 -1.442695, %v211_v47  ;;  %v215_v50 = vadd.f32 %v214_v48, %v135_v41 }
 0x12d   :  { %v216_v51 = vpop.f32.mrf.mxu0 }
 0x12e   :  { %434 = vpow2.f32 %v382_v49  ;;  %v383_v52 = vmul.f32 -1.442695, %v215_v50  ;;  %v217_v53 = vadd.f32 %v216_v51, %v139_v42 }
 0x130   :  { %436 = vpow2.f32 %v383_v52  ;;  %v384_v54 = vmul.f32 -1.442695, %v217_v53 }
 0x132   :  { %438 = vpow2.f32 %v384_v54 }
 0x139   :  { %v433_v55 = vpop.eup %432 }
 0x13a   :  { %v231_v56 = vadd.f32 1.0, %v433_v55 }
 0x13b   :  { %v435_v57 = vpop.eup %434 }
 0x13c   :  { %v232_v58 = vadd.f32 1.0, %v435_v57  ;;  %440 = vrcp.f32 %v231_v56 }
 0x13d   :  { %v437_v59 = vpop.eup %436 }
 0x13e   :  { %442 = vrcp.f32 %v232_v58  ;;  %v233_v60 = vadd.f32 1.0, %v437_v59 }
 0x13f   :  { %v439_v61 = vpop.eup %438 }
 0x140   :  { %v234_v62 = vadd.f32 1.0, %v439_v61  ;;  %444 = vrcp.f32 %v233_v60 }
 0x142   :  { %446 = vrcp.f32 %v234_v62 }
 0x149   :  { %v441_v63 = vpop.eup %440 }
 0x14a   :  { %v243_v2 = vmul.f32 %v441_v63, %v209_v44 }
 0x14b   :  { %v443_v0 = vpop.eup %442 }
 0x14c   :  { %v244_v1 = vmul.f32 %v443_v0, %v211_v47 }
 0x14d   :  { %v445_v3 = vpop.eup %444 }
 0x14e   :  { %350 = vmatprep.mubr.f32.mxu1 %v244_v1  ;;  %v245_v6 = vmul.f32 %v445_v3, %v215_v50 }
 0x14f   :  { %v447_v4 = vpop.eup %446  ;;  %351 = vmatmul.mubr.f32.vlgmr.msra.gmra.mxu1 %v243_v2 }
 0x150   :  { %v246_v5 = vmul.f32 %v447_v4, %v217_v53 }
 0x152   :  { %355 = vmatprep.mubr.f32.mxu1 %v246_v5 }
 0x153   :  { %356 = vmatmul.mubr.f32.gmra.mxu1 %v245_v6 }
 0x20f   :  { %v418_v7 = vpop.f32.mrf.mxu1 }
 0x211   :  { %v419_v9 = vpop.f32.mrf.mxu1 }
 0x212   :  { %v420_v10 = vadd.f32 %v419_v9, %v418_v7 }
 0x213   :  { %v421_v11 = vpop.f32.mrf.mxu1 }
 0x214   :  { %v353_v12 = vadd.f32 %v420_v10, %v385_v8 }
 0x215   :  { %v422_v13 = vpop.f32.mrf.mxu1 }
 0x216   :  { %361 = vst [vmem:[#allocation8] sm:$0xff] %v353_v12  ;;  %v423_v14 = vadd.f32 %v422_v13, %v421_v11 }
 0x218   :  { %v358_v15 = vadd.f32 %v423_v14, %v385_v8 }
 0x21a   :  { %362 = vst [vmem:[#allocation8 + $0x8] sm:$0xff] %v358_v15 }
 0x21b   :  { %519 = shalt.err (!%p516_p5)
}
 0x21c   :  { %374 = dma.vmem_to_hbm [thread:$0]  %s369_s13, 256, %s601_s5, [#allocation4], %s539_s1, %s539_s1, %s540_s8  }
 0x21d   :  { %532 = dma.done.wait [#allocation4], 256  }
 0x21e   :  { %533 = vsyncadd [#allocation4], 4294967040 }
 0x21f   :  { %378 = vsyncpa [#allocation3], 1 }
 0x220   :  { %379 = vsyncpa [#allocation6], 1 }
 0x221   :  { %380 = vsyncpa [#allocation4], 1 }

// kernel: tpu_custom_call.1
= control target key start
LH: loop header
LB: loop body
LE: loop exit
PB: predicated region body
PF: predicated region fallthrough
CT: control target
= control target key end

     0   :  { %10 = vsyncpa [#allocation3], 0  ;;  %s596_s0 = inlined_call_operand.hbm [shape: f32[16,256], index: 0, kind: input, shape index: {}]   ;;  %s597_s1 = inlined_call_operand.hbm [shape: f32[256,256], index: 1, kind: input, shape index: {}]   ;;  %s598_s2 = inlined_call_operand.vmem [shape: f32[1,256], index: 2, kind: input, shape index: {}]   ;;  %s599_s3 = inlined_call_operand.hbm [shape: f32[256,128], index: 3, kind: input, shape index: {}]   ;;  %s600_s4 = inlined_call_operand.vmem [shape: f32[1,128], index: 4, kind: input, shape index: {}]   ;;  %s601_s5 = inlined_call_operand.hbm [shape: f32[16,128], index: 5, kind: output, shape index: {}]  }
   0x1   :  { %11 = vsyncpa [#allocation6], 0 }
   0x2   :  { %12 = vsyncpa [#allocation4], 0  ;;  %s534_s18 = smov [#allocation5]   ;;  %s535_s20 = smov [#allocation2]  }
   0x3   :  { %s30_s19 = sshll.u32 %s534_s18, 4  ;;  %s18_s21 = sshll.u32 %s535_s20, 4  ;;  %s31_s19 = int_to_ptr.vmem [resolvable:$true] %s30_s19  ;;  %s19_s21 = int_to_ptr.vmem [resolvable:$true] %s18_s21 }
   0x4   :  { %s456_s22 = scalar_lea.vmem %s31_s19, 8192  ;;  %p461_p1 = scmp.lt.s32.totalorder %s31_s19, %s31_s19 }
   0x5   :  { %p457_p0 = scmp.ne.s32.totalorder %s31_s19, %s456_s22  ;;  %p462_p2 = scmp.lt.s32.totalorder %s456_s22, %s456_s22 }
   0x7   :  { %p463_p3 = por %p462_p2, %p461_p1 }
   0x9   :  { %p464_p4 = pnand %p463_p3, %p457_p0 }
   0xb   :  { %467 = shalt.err (!%p464_p4)
}
   0xc   :  { %s536_s23 = smov 256   ;;  %s537_s24 = smov 16  }
   0xd   :  { %36 = dma.hbm_to_vmem [thread:$0]  %s597_s1, 8192, %s31_s19, [#allocation6], %s536_s23, %s536_s23, %s537_s24  }
   0xe   :  { %s476_s27 = scalar_lea.vmem %s19_s21, 512  ;;  %p481_p6 = scmp.lt.s32.totalorder %s19_s21, %s19_s21 }
   0xf   :  { %p477_p5 = scmp.ne.s32.totalorder %s19_s21, %s476_s27  ;;  %p482_p7 = scmp.lt.s32.totalorder %s476_s27, %s476_s27 }
  0x11   :  { %p483_p8 = por %p482_p7, %p481_p6 }
  0x13   :  { %p484_p9 = pnand %p483_p8, %p477_p5 }
  0x15   :  { %487 = shalt.err (!%p484_p9)
}
  0x16   :  { %24 = dma.hbm_to_vmem [thread:$0]  %s596_s0, 512, %s19_s21, [#allocation3], %s536_s23, %s536_s23, %s537_s24  }
  0x17   :  { %s538_s30 = smov [#allocation7]  }
  0x18   :  { %s44_s6 = sshll.u32 %s538_s30, 4  ;;  %s45_s6 = int_to_ptr.vmem [resolvable:$true] %s44_s6 }
  0x19   :  { %s496_s7 = scalar_lea.vmem %s45_s6, 4096  ;;  %p501_p11 = scmp.lt.s32.totalorder %s45_s6, %s45_s6 }
  0x1a   :  { %p497_p10 = scmp.ne.s32.totalorder %s45_s6, %s496_s7  ;;  %p502_p12 = scmp.lt.s32.totalorder %s496_s7, %s496_s7 }
  0x1c   :  { %p503_p13 = por %p502_p12, %p501_p11 }
  0x1e   :  { %p504_p0 = pnand %p503_p13, %p497_p10 }
  0x20   :  { %507 = shalt.err (!%p504_p0)
}
  0x21   :  { %s539_s1 = smov 128   ;;  %s540_s8 = smov 8  }
  0x22   :  { %50 = dma.hbm_to_vmem [thread:$0]  %s599_s3, 4096, %s45_s6, [#allocation6], %s539_s1, %s539_s1, %s540_s8  }
  0x23   :  { %528 = dma.done.wait [#allocation3], 512  }
  0x24   :  { %529 = vsyncadd [#allocation3], 4294966784 }
  0x25   :  { %530 = dma.done.wait [#allocation6], 12288  }
  0x26   :  { %531 = vsyncadd [#allocation6], 4294955008  ;;  %v97_v0 = vld [vmem:[#allocation5 + $0xf8] sm:$0xff]  ;;  %v96_v1 = vld [vmem:[#allocation5 + $0xf0] sm:$0xff]  ;;  %s541_s12 = smov [#allocation8]  }
  0x27   :  { %v95_v2 = vld [vmem:[#allocation5 + $0xe8] sm:$0xff]  ;;  %142 = vmatprep.subr.mxu0 %v97_v0  ;;  %v94_v3 = vld [vmem:[#allocation5 + $0xe0] sm:$0xff]  ;;  %v93_v4 = vld [vmem:[#allocation5 + $0xd8] sm:$0xff]  ;;  %s368_s13 = sshll.u32 %s541_s12, 4  ;;  %s369_s13 = int_to_ptr.vmem [resolvable:$true] %s368_s13 }
  0x28   :  { %143 = vmatpush1.msra.mxu0 %v96_v1  ;;  %v92_v5 = vld [vmem:[#allocation5 + $0xd0] sm:$0xff]  ;;  %v91_v6 = vld [vmem:[#allocation5 + $0xc8] sm:$0xff]  ;;  %v90_v7 = vld [vmem:[#allocation5 + $0xc0] sm:$0xff]  ;;  %s508_s14 = scalar_lea.vmem %s369_s13, 256  ;;  %p513_p2 = scmp.lt.s32.totalorder %s369_s13, %s369_s13 }
  0x29   :  { %144 = vmatprep.subr.mxu0 %v95_v2  ;;  %v89_v8 = vld [vmem:[#allocation5 + $0xb8] sm:$0xff]  ;;  %v88_v9 = vld [vmem:[#allocation5 + $0xb0] sm:$0xff]  ;;  %v87_v10 = vld [vmem:[#allocation5 + $0xa8] sm:$0xff]  ;;  %p509_p1 = scmp.ne.s32.totalorder %s369_s13, %s508_s14  ;;  %p514_p3 = scmp.lt.s32.totalorder %s508_s14, %s508_s14 }
  0x2a   :  { %145 = vmatpush1.msra.mxu0 %v94_v3  ;;  %v86_v11 = vld [vmem:[#allocation5 + $0xa0] sm:$0xff]  ;;  %v85_v12 = vld [vmem:[#allocation5 + $0x98] sm:$0xff]  ;;  %v84_v13 = vld [vmem:[#allocation5 + $0x90] sm:$0xff] }
  0x2b   :  { %146 = vmatprep.subr.mxu0 %v93_v4  ;;  %v83_v14 = vld [vmem:[#allocation5 + $0x88] sm:$0xff]  ;;  %v82_v15 = vld [vmem:[#allocation5 + $0x80] sm:$0xff]  ;;  %v81_v16 = vld [vmem:[#allocation5 + $0x78] sm:$0xff]  ;;  %p515_p4 = por %p514_p3, %p513_p2 }
  0x2c   :  { %147 = vmatpush1.msra.mxu0 %v92_v5  ;;  %v80_v17 = vld [vmem:[#allocation5 + $0x70] sm:$0xff]  ;;  %v79_v18 = vld [vmem:[#allocation5 + $0x68] sm:$0xff]  ;;  %v78_v19 = vld [vmem:[#allocation5 + $0x60] sm:$0xff] }
  0x2d   :  { %148 = vmatprep.subr.mxu0 %v91_v6  ;;  %v77_v20 = vld [vmem:[#allocation5 + $0x58] sm:$0xff]  ;;  %v76_v21 = vld [vmem:[#allocation5 + $0x50] sm:$0xff]  ;;  %v75_v22 = vld [vmem:[#allocation5 + $0x48] sm:$0xff]  ;;  %p516_p5 = pnand %p515_p4, %p509_p1 }
  0x2e   :  { %149 = vmatpush1.msra.mxu0 %v90_v7  ;;  %v74_v23 = vld [vmem:[#allocation5 + $0x40] sm:$0xff]  ;;  %v63_v24 = vld [vmem:[#allocation2 + $0x8] sm:$0xff]  ;;  %v73_v25 = vld [vmem:[#allocation5 + $0x38] sm:$0xff] }
  0x2f   :  { %150 = vmatprep.subr.mxu0 %v89_v8  ;;  %206 = vmatprep.mubr.f32.mxu0 %v63_v24  ;;  %v72_v26 = vld [vmem:[#allocation5 + $0x30] sm:$0xff]  ;;  %v71_v27 = vld [vmem:[#allocation5 + $0x28] sm:$0xff]  ;;  %v70_v28 = vld [vmem:[#allocation5 + $0x20] sm:$0xff] }
  0x30   :  { %151 = vmatpush1.msra.mxu0 %v88_v9  ;;  %v69_v29 = vld [vmem:[#allocation5 + $0x18] sm:$0xff]  ;;  %v68_v30 = vld [vmem:[#allocation5 + $0x10] sm:$0xff]  ;;  %v67_v31 = vld [vmem:[#allocation5 + $0x8] sm:$0xff] }
  0x31   :  { %152 = vmatprep.subr.mxu0 %v87_v10  ;;  %v66_v32 = vld [vmem:[#allocation5] sm:$0xff]  ;;  %v129_v33 = vld [vmem:[#allocation5 + $0x1f8] sm:$0xff]  ;;  %v128_v34 = vld [vmem:[#allocation5 + $0x1f0] sm:$0xff] }
  0x32   :  { %153 = vmatpush1.msra.mxu0 %v86_v11  ;;  %v127_v35 = vld [vmem:[#allocation5 + $0x1e8] sm:$0xff]  ;;  %v126_v36 = vld [vmem:[#allocation5 + $0x1e0] sm:$0xff]  ;;  %v125_v37 = vld [vmem:[#allocation5 + $0x1d8] sm:$0xff] }
  0x33   :  { %154 = vmatprep.subr.mxu0 %v85_v12  ;;  %v124_v38 = vld [vmem:[#allocation5 + $0x1d0] sm:$0xff]  ;;  %v123_v39 = vld [vmem:[#allocation5 + $0x1c8] sm:$0xff]  ;;  %v122_v40 = vld [vmem:[#allocation5 + $0x1c0] sm:$0xff] }
  0x34   :  { %155 = vmatpush1.msra.mxu0 %v84_v13  ;;  %v121_v41 = vld [vmem:[#allocation5 + $0x1b8] sm:$0xff]  ;;  %v120_v42 = vld [vmem:[#allocation5 + $0x1b0] sm:$0xff]  ;;  %v119_v43 = vld [vmem:[#allocation5 + $0x1a8] sm:$0xff] }
  0x35   :  { %156 = vmatprep.subr.mxu0 %v83_v14  ;;  %v118_v44 = vld [vmem:[#allocation5 + $0x1a0] sm:$0xff]  ;;  %v117_v45 = vld [vmem:[#allocation5 + $0x198] sm:$0xff]  ;;  %v116_v46 = vld [vmem:[#allocation5 + $0x190] sm:$0xff] }
  0x36   :  { %157 = vmatpush1.msra.mxu0 %v82_v15  ;;  %v115_v47 = vld [vmem:[#allocation5 + $0x188] sm:$0xff]  ;;  %v114_v48 = vld [vmem:[#allocation5 + $0x180] sm:$0xff]  ;;  %v113_v49 = vld [vmem:[#allocation5 + $0x178] sm:$0xff] }
  0x37   :  { %158 = vmatprep.subr.mxu0 %v81_v16  ;;  %v112_v50 = vld [vmem:[#allocation5 + $0x170] sm:$0xff]  ;;  %v111_v51 = vld [vmem:[#allocation5 + $0x168] sm:$0xff]  ;;  %v110_v52 = vld [vmem:[#allocation5 + $0x160] sm:$0xff] }
  0x38   :  { %159 = vmatpush1.msra.mxu0 %v80_v17  ;;  %v109_v53 = vld [vmem:[#allocation5 + $0x158] sm:$0xff]  ;;  %v108_v54 = vld [vmem:[#allocation5 + $0x150] sm:$0xff]  ;;  %v107_v55 = vld [vmem:[#allocation5 + $0x148] sm:$0xff] }
  0x39   :  { %160 = vmatprep.subr.mxu0 %v79_v18  ;;  %v106_v56 = vld [vmem:[#allocation5 + $0x140] sm:$0xff]  ;;  %v105_v57 = vld [vmem:[#allocation5 + $0x138] sm:$0xff]  ;;  %v104_v58 = vld [vmem:[#allocation5 + $0x130] sm:$0xff] }
  0x3a   :  { %161 = vmatpush1.msra.mxu0 %v78_v19  ;;  %v103_v59 = vld [vmem:[#allocation5 + $0x128] sm:$0xff]  ;;  %v102_v60 = vld [vmem:[#allocation5 + $0x120] sm:$0xff]  ;;  %v101_v61 = vld [vmem:[#allocation5 + $0x118] sm:$0xff] }
  0x3b   :  { %162 = vmatprep.subr.mxu0 %v77_v20  ;;  %v100_v62 = vld [vmem:[#allocation5 + $0x110] sm:$0xff]  ;;  %v99_v63 = vld [vmem:[#allocation5 + $0x108] sm:$0xff]  ;;  %v98_v0 = vld [vmem:[#allocation5 + $0x100] sm:$0xff] }
  0x3c   :  { %163 = vmatpush1.msra.mxu0 %v76_v21  ;;  %v62_v1 = vld [vmem:[#allocation2] sm:$0xff]  ;;  %v65_v2 = vld [vmem:[#allocation2 + $0x18] sm:$0xff]  ;;  %v64_v3 = vld [vmem:[#allocation2 + $0x10] sm:$0xff] }
  0x3d   :  { %164 = vmatprep.subr.mxu0 %v75_v22  ;;  %v278_v4 = vld [vmem:[#allocation7 + $0xf8] sm:$0xff]  ;;  %v277_v6 = vld [vmem:[#allocation7 + $0xf0] sm:$0xff]  ;;  %v276_v8 = vld [vmem:[#allocation7 + $0xe8] sm:$0xff] }
  0x3e   :  { %165 = vmatpush1.msra.mxu0 %v74_v23  ;;  %386 = vmatprep.subr.mxu1 %v278_v4  ;;  %v262_v5 = vld [vmem:[#allocation7 + $0x78] sm:$0xff]  ;;  %v261_v7 = vld [vmem:[#allocation7 + $0x70] sm:$0xff]  ;;  %v260_v9 = vld [vmem:[#allocation7 + $0x68] sm:$0xff] }
  0x3f   :  { %166 = vmatprep.subr.mxu0 %v73_v25  ;;  %387 = vmatpush3.msra.mxu1 %v262_v5  ;;  %v275_v10 = vld [vmem:[#allocation7 + $0xe0] sm:$0xff]  ;;  %v274_v12 = vld [vmem:[#allocation7 + $0xd8] sm:$0xff]  ;;  %v273_v14 = vld [vmem:[#allocation7 + $0xd0] sm:$0xff] }
  0x40   :  { %167 = vmatpush1.msra.mxu0 %v72_v26  ;;  %388 = vmatprep.subr.mxu1 %v277_v6  ;;  %v259_v11 = vld [vmem:[#allocation7 + $0x60] sm:$0xff]  ;;  %v258_v13 = vld [vmem:[#allocation7 + $0x58] sm:$0xff]  ;;  %v257_v15 = vld [vmem:[#allocation7 + $0x50] sm:$0xff] }
  0x41   :  { %168 = vmatprep.subr.mxu0 %v71_v27  ;;  %389 = vmatpush3.msra.mxu1 %v261_v7  ;;  %v272_v16 = vld [vmem:[#allocation7 + $0xc8] sm:$0xff]  ;;  %v271_v18 = vld [vmem:[#allocation7 + $0xc0] sm:$0xff]  ;;  %v270_v20 = vld [vmem:[#allocation7 + $0xb8] sm:$0xff] }
  0x42   :  { %169 = vmatpush1.msra.mxu0 %v70_v28  ;;  %390 = vmatprep.subr.mxu1 %v276_v8  ;;  %v256_v17 = vld [vmem:[#allocation7 + $0x48] sm:$0xff]  ;;  %v255_v19 = vld [vmem:[#allocation7 + $0x40] sm:$0xff]  ;;  %v254_v21 = vld [vmem:[#allocation7 + $0x38] sm:$0xff] }
  0x43   :  { %170 = vmatprep.subr.mxu0 %v69_v29  ;;  %391 = vmatpush3.msra.mxu1 %v260_v9  ;;  %v269_v22 = vld [vmem:[#allocation7 + $0xb0] sm:$0xff]  ;;  %v268_v24 = vld [vmem:[#allocation7 + $0xa8] sm:$0xff]  ;;  %v267_v26 = vld [vmem:[#allocation7 + $0xa0] sm:$0xff] }
  0x44   :  { %171 = vmatpush1.msra.mxu0 %v68_v30  ;;  %392 = vmatprep.subr.mxu1 %v275_v10  ;;  %v253_v23 = vld [vmem:[#allocation7 + $0x30] sm:$0xff]  ;;  %v252_v25 = vld [vmem:[#allocation7 + $0x28] sm:$0xff]  ;;  %v251_v27 = vld [vmem:[#allocation7 + $0x20] sm:$0xff] }
  0x45   :  { %172 = vmatprep.subr.mxu0 %v67_v31  ;;  %393 = vmatpush3.msra.mxu1 %v259_v11  ;;  %v266_v28 = vld [vmem:[#allocation7 + $0x98] sm:$0xff]  ;;  %v265_v30 = vld [vmem:[#allocation7 + $0x90] sm:$0xff]  ;;  %v385_v8 = vld [vmem:[%s600_s4] ss:$0 sm:$0xff] }
  0x46   :  { %173 = vmatpush1.msra.mxu0 %v66_v32  ;;  %394 = vmatprep.subr.mxu1 %v274_v12  ;;  %v250_v29 = vld [vmem:[#allocation7 + $0x18] sm:$0xff]  ;;  %v249_v31 = vld [vmem:[#allocation7 + $0x10] sm:$0xff]  ;;  %v264_v32 = vld [vmem:[#allocation7 + $0x88] sm:$0xff] }
  0x47   :  { %174 = vmatprep.subr.mxu0 %v129_v33  ;;  %395 = vmatpush3.msra.mxu1 %v258_v13  ;;  %v248_v33 = vld [vmem:[#allocation7 + $0x8] sm:$0xff] }
  0x48   :  { %175 = vmatpush2.msra.mxu0 %v128_v34  ;;  %396 = vmatprep.subr.mxu1 %v273_v14  ;;  %v263_v34 = vld [vmem:[#allocation7 + $0x80] sm:$0xff] }
  0x49   :  { %176 = vmatprep.subr.mxu0 %v127_v35  ;;  %397 = vmatpush3.msra.mxu1 %v257_v15  ;;  %v247_v35 = vld [vmem:[#allocation7] sm:$0xff] }
  0x4a   :  { %177 = vmatpush2.msra.mxu0 %v126_v36  ;;  %398 = vmatprep.subr.mxu1 %v272_v16  ;;  %v132_v36 = vlaneseq }
  0x4b   :  { %178 = vmatprep.subr.mxu0 %v125_v37  ;;  %399 = vmatpush3.msra.mxu1 %v256_v17 }
  0x4c   :  { %179 = vmatpush2.msra.mxu0 %v124_v38  ;;  %400 = vmatprep.subr.mxu1 %v271_v18  ;;  %v133_v37 = vshrl.u32 %v132_v36, 7 }
  0x4d   :  { %180 = vmatprep.subr.mxu0 %v123_v39  ;;  %401 = vmatpush3.msra.mxu1 %v255_v19  ;;  %v130_v39 = vld [vmem:[%s598_s2] sm:$0x3] }
  0x4e   :  { %181 = vmatpush2.msra.mxu0 %v122_v40  ;;  %402 = vmatprep.subr.mxu1 %v270_v20  ;;  %v134_v38 = vsub.s32 0, %v133_v37  ;;  %v138_v40 = vsub.s32 1, %v133_v37 }
  0x4f   :  { %182 = vmatprep.subr.mxu0 %v121_v41  ;;  %403 = vmatpush3.msra.mxu1 %v254_v21 }
  0x50   :  { %183 = vmatpush2.msra.mxu0 %v120_v42  ;;  %404 = vmatprep.subr.mxu1 %v269_v22  ;;  %v135_v41 = vrot.slane %v130_v39, %v134_v38  ;;  %v139_v42 = vrot.slane %v130_v39, %v138_v40 }
  0x51   :  { %184 = vmatprep.subr.mxu0 %v119_v43  ;;  %405 = vmatpush3.msra.mxu1 %v253_v23 }
  0x52   :  { %185 = vmatpush2.msra.mxu0 %v118_v44  ;;  %406 = vmatprep.subr.mxu1 %v268_v24 }
  0x53   :  { %186 = vmatprep.subr.mxu0 %v117_v45  ;;  %407 = vmatpush3.msra.mxu1 %v252_v25 }
  0x54   :  { %187 = vmatpush2.msra.mxu0 %v116_v46  ;;  %408 = vmatprep.subr.mxu1 %v267_v26 }
  0x55   :  { %188 = vmatprep.subr.mxu0 %v115_v47  ;;  %409 = vmatpush3.msra.mxu1 %v251_v27 }
  0x56   :  { %189 = vmatpush2.msra.mxu0 %v114_v48  ;;  %410 = vmatprep.subr.mxu1 %v266_v28 }
  0x57   :  { %190 = vmatprep.subr.mxu0 %v113_v49  ;;  %411 = vmatpush3.msra.mxu1 %v250_v29 }
  0x58   :  { %191 = vmatpush2.msra.mxu0 %v112_v50  ;;  %412 = vmatprep.subr.mxu1 %v265_v30 }
  0x59   :  { %192 = vmatprep.subr.mxu0 %v111_v51  ;;  %413 = vmatpush3.msra.mxu1 %v249_v31 }
  0x5a   :  { %193 = vmatpush2.msra.mxu0 %v110_v52  ;;  %414 = vmatprep.subr.mxu1 %v264_v32 }
  0x5b   :  { %194 = vmatprep.subr.mxu0 %v109_v53  ;;  %415 = vmatpush3.msra.mxu1 %v248_v33 }
  0x5c   :  { %195 = vmatpush2.msra.mxu0 %v108_v54  ;;  %416 = vmatprep.subr.mxu1 %v263_v34 }
  0x5d   :  { %196 = vmatprep.subr.mxu0 %v107_v55  ;;  %417 = vmatpush3.msra.mxu1 %v247_v35 }
  0x5e   :  { %197 = vmatpush2.msra.mxu0 %v106_v56 }
  0x5f   :  { %198 = vmatprep.subr.mxu0 %v105_v57 }
  0x60   :  { %199 = vmatpush2.msra.mxu0 %v104_v58 }
  0x61   :  { %200 = vmatprep.subr.mxu0 %v103_v59 }
  0x62   :  { %201 = vmatpush2.msra.mxu0 %v102_v60 }
  0x63   :  { %202 = vmatprep.subr.mxu0 %v101_v61 }
  0x64   :  { %203 = vmatpush2.msra.mxu0 %v100_v62 }
  0x65   :  { %204 = vmatprep.subr.mxu0 %v99_v63 }
  0x66   :  { %205 = vmatpush2.msra.mxu0 %v98_v0 }
  0x67   :  { %207 = vmatmul.mubr.f32.vlgmr.msra.gmra.mxu0 %v62_v1 }
  0x68   :  { %212 = vmatprep.mubr.f32.mxu0 %v65_v2 }
  0x6b   :  { %213 = vmatmul.mubr.f32.gmra.mxu0 %v64_v3 }
 0x127   :  { %v208_v43 = vpop.f32.mrf.mxu0 }
 0x128   :  { %v209_v44 = vadd.f32 %v208_v43, %v135_v41 }
 0x129   :  { %v210_v45 = vpop.f32.mrf.mxu0 }
 0x12a   :  { %v381_v46 = vmul.f32 -1.442695, %v209_v44  ;;  %v211_v47 = vadd.f32 %v210_v45, %v139_v42 }
 0x12b   :  { %v214_v48 = vpop.f32.mrf.mxu0 }
 0x12c   :  { %432 = vpow2.f32 %v381_v46  ;;  %v382_v49 = vmul.f32 -1.442695, %v211_v47  ;;  %v215_v50 = vadd.f32 %v214_v48, %v135_v41 }
 0x12d   :  { %v216_v51 = vpop.f32.mrf.mxu0 }
 0x12e   :  { %434 = vpow2.f32 %v382_v49  ;;  %v383_v52 = vmul.f32 -1.442695, %v215_v50  ;;  %v217_v53 = vadd.f32 %v216_v51, %v139_v42 }
 0x130   :  { %436 = vpow2.f32 %v383_v52  ;;  %v384_v54 = vmul.f32 -1.442695, %v217_v53 }
 0x132   :  { %438 = vpow2.f32 %v384_v54 }
 0x139   :  { %v433_v55 = vpop.eup %432 }
 0x13a   :  { %v231_v56 = vadd.f32 1.0, %v433_v55 }
 0x13b   :  { %v435_v57 = vpop.eup %434 }
 0x13c   :  { %v232_v58 = vadd.f32 1.0, %v435_v57  ;;  %440 = vrcp.f32 %v231_v56 }
 0x13d   :  { %v437_v59 = vpop.eup %436 }
 0x13e   :  { %442 = vrcp.f32 %v232_v58  ;;  %v233_v60 = vadd.f32 1.0, %v437_v59 }
 0x13f   :  { %v439_v61 = vpop.eup %438 }
 0x140   :  { %v234_v62 = vadd.f32 1.0, %v439_v61  ;;  %444 = vrcp.f32 %v233_v60 }
 0x142   :  { %446 = vrcp.f32 %v234_v62 }
 0x149   :  { %v441_v63 = vpop.eup %440 }
 0x14a   :  { %v243_v2 = vmul.f32 %v441_v63, %v209_v44 }
 0x14b   :  { %v443_v0 = vpop.eup %442 }
 0x14c   :  { %v244_v1 = vmul.f32 %v443_v0, %v211_v47 }
 0x14d   :  { %v445_v3 = vpop.eup %444 }
 0x14e   :  { %350 = vmatprep.mubr.f32.mxu1 %v244_v1  ;;  %v245_v6 = vmul.f32 %v445_v3, %v215_v50 }
 0x14f   :  { %v447_v4 = vpop.eup %446  ;;  %351 = vmatmul.mubr.f32.vlgmr.msra.gmra.mxu1 %v243_v2 }
 0x150   :  { %v246_v5 = vmul.f32 %v447_v4, %v217_v53 }
 0x152   :  { %355 = vmatprep.mubr.f32.mxu1 %v246_v5 }
 0x153   :  { %356 = vmatmul.mubr.f32.gmra.mxu1 %v245_v6 }
 0x20f   :  { %v418_v7 = vpop.f32.mrf.mxu1 }
 0x211   :  { %v419_v9 = vpop.f32.mrf.mxu1 }
 0x212   :  { %v420_v10 = vadd.f32 %v419_v9, %v418_v7 }
 0x213   :  { %v421_v11 = vpop.f32.mrf.mxu1 }
 0x214   :  { %v353_v12 = vadd.f32 %v420_v10, %v385_v8 }
 0x215   :  { %v422_v13 = vpop.f32.mrf.mxu1 }
 0x216   :  { %361 = vst [vmem:[#allocation8] sm:$0xff] %v353_v12  ;;  %v423_v14 = vadd.f32 %v422_v13, %v421_v11 }
 0x218   :  { %v358_v15 = vadd.f32 %v423_v14, %v385_v8 }
 0x21a   :  { %362 = vst [vmem:[#allocation8 + $0x8] sm:$0xff] %v358_v15 }
 0x21b   :  { %519 = shalt.err (!%p516_p5)
}
 0x21c   :  { %374 = dma.vmem_to_hbm [thread:$0]  %s369_s13, 256, %s601_s5, [#allocation4], %s539_s1, %s539_s1, %s540_s8  }
 0x21d   :  { %532 = dma.done.wait [#allocation4], 256  }
 0x21e   :  { %533 = vsyncadd [#allocation4], 4294967040 }
 0x21f   :  { %378 = vsyncpa [#allocation3], 1 }
 0x220   :  { %379 = vsyncpa [#allocation6], 1 }
 0x221   :  { %380 = vsyncpa [#allocation4], 1 }

</bundles_post_ra>
